<compile_context>
chip_gen: v6e
topology: v6e:2x2x1
jax: 0.10.0
libtpu: 0.0.40
codegen_flags: <defaults>
</compile_context>

<pallas_src>
import jax
import jax.numpy as jnp
from jax.experimental import pallas as pl
from jax.experimental.pallas import tpu as pltpu


def mlp_kernel(x_ref, w1_ref, b1_ref, w2t_ref, b2_ref, o_ref):
    # Layout: batch on the lane axis.
    #   x_ref  : [F, BT] = [1, BT]
    #   w1_ref : [H, F]  = [H, 1]
    #   b1_ref : [H, 1]
    #   w2t_ref: [H, O]  = [H, 1]   (predict weight, transposed)
    #   b2_ref : [O, 1]  = [1, 1]
    #   o_ref  : [O, BT] = [1, BT]
    x = x_ref[...]                                   # [1, BT]
    # hidden = relu(W1 @ x + b1): F=1 -> pure VPU broadcast outer product.
    h = jnp.maximum(w1_ref[...] * x + b1_ref[...], 0.0)        # [H, BT]
    # predict = W2 @ h + b2: O=1 -> multiply + sublane reduction (XLU), no MXU.
    out = jnp.sum(h * w2t_ref[...], axis=0, keepdims=True) + b2_ref[...]  # [1, BT]
    o_ref[...] = out.astype(o_ref.dtype)


def net_forward(x, w1, b1, w2, b2, *, batch_tile=128):
    """Forward pass of Net.

    x: [B, F] with F == 1 (torch layout).
    w1: [H, F], b1: [H]   (torch.nn.Linear(hidden) params)
    w2: [O, H], b2: [O]   (torch.nn.Linear(predict) params), O == 1.
    Returns [B, O] float32.
    """
    B, F = x.shape
    H, _ = w1.shape
    O, _ = w2.shape
    assert F == 1 and O == 1, "kernel is specialized to the Net spec (F=1, O=1)"

    BT = batch_tile
    n_tiles = pl.cdiv(B, BT)
    Bp = n_tiles * BT

    # Lane-dense, padded layout: batch on the last (lane) axis.
    x_t = jnp.zeros((F, Bp), jnp.float32).at[:, :B].set(x.T)   # [1, Bp]
    b1_c = b1.reshape(H, 1).astype(jnp.float32)                # [H, 1]
    w1_c = w1.astype(jnp.float32)                              # [H, 1]
    w2_t = w2.T.astype(jnp.float32)                            # [H, 1]
    b2_c = b2.reshape(O, 1).astype(jnp.float32)                # [1, 1]

    cost = pl.CostEstimate(
        flops=4 * B * H,               # two muladds per (batch, hidden) element
        transcendentals=0,
        bytes_accessed=4 * (B * F + H * F + H + H * O + O + B * O),
    )

    out_t = pl.pallas_call(
        mlp_kernel,
        out_shape=jax.ShapeDtypeStruct((O, Bp), jnp.float32),
        grid=(n_tiles,),
        in_specs=[
            pl.BlockSpec((F, BT), lambda i: (0, i)),   # x tile: batch on lanes
            pl.BlockSpec((H, F), lambda i: (0, 0)),    # W1 resident across batch
            pl.BlockSpec((H, 1), lambda i: (0, 0)),    # b1 resident
            pl.BlockSpec((H, O), lambda i: (0, 0)),    # W2^T resident
            pl.BlockSpec((O, 1), lambda i: (0, 0)),    # b2 resident
        ],
        out_specs=pl.BlockSpec((O, BT), lambda i: (0, i)),
        compiler_params=pltpu.CompilerParams(
            dimension_semantics=("parallel",),
        ),
        cost_estimate=cost,
    )(x_t, w1_c, b1_c, w2_t, b2_c)

    return out_t[:, :B].T                              # back to [B, O]


def init_params(key, n_feature, n_hidden, n_output):
    """Deterministic init mirroring torch.nn.Linear shapes (weight: [out, in])."""
    k1, k2, k3, k4 = jax.random.split(key, 4)
    bound1 = 1.0 / jnp.sqrt(n_feature)
    bound2 = 1.0 / jnp.sqrt(n_hidden)
    w1 = jax.random.uniform(k1, (n_hidden, n_feature), jnp.float32, -bound1, bound1)
    b1 = jax.random.uniform(k2, (n_hidden,), jnp.float32, -bound1, bound1)
    w2 = jax.random.uniform(k3, (n_output, n_hidden), jnp.float32, -bound2, bound2)
    b2 = jax.random.uniform(k4, (n_output,), jnp.float32, -bound2, bound2)
    return w1, b1, w2, b2


if __name__ == "__main__":
    n_feature, n_hidden, n_output = 1, 32, 1
    batch = 100

    key = jax.random.PRNGKey(0)
    w1, b1, w2, b2 = init_params(key, n_feature, n_hidden, n_output)

    # Input like the reference script: x = unsqueeze(linspace(-1, 1, 100), dim=1) -> [100, 1]
    x = jnp.linspace(-1.0, 1.0, batch, dtype=jnp.float32).reshape(batch, n_feature)

    out = net_forward(x, w1, b1, w2, b2)
    out = jax.block_until_ready(out)

    # Pure-JAX reference (same math as torch: relu(x @ W1.T + b1) @ W2.T + b2).
    ref = jnp.maximum(x @ w1.T + b1, 0.0) @ w2.T + b2
    assert out.shape == (batch, n_output)
    assert jnp.allclose(out, ref, atol=1e-5), "mismatch vs reference"

    print("KERNEL_OK")
</pallas_src>

<mosaic_0001>
module attributes {stable_mosaic.version = 11 : i64} {
  func.func @mlp_kernel(%arg0: i32, %arg1: memref<1x128xf32, #tpu.memory_space<vmem>>, %arg2: memref<32x1xf32, #tpu.memory_space<vmem>>, %arg3: memref<32x1xf32, #tpu.memory_space<vmem>>, %arg4: memref<32x1xf32, #tpu.memory_space<vmem>>, %arg5: memref<1x1xf32, #tpu.memory_space<vmem>>, %arg6: memref<1x128xf32, #tpu.memory_space<vmem>>) attributes {dimension_semantics = [#tpu.dimension_semantics<parallel>], iteration_bounds = array<i64: 1>, scalar_prefetch = 0 : i64, scratch_operands = 0 : i64, tpu.core_type = #tpu.core_type<tc>, window_params = [{transform_indices = @transform_0, window_bounds = array<i64: 1, 128>}, {pipeline_mode = #tpu.pipeline_mode<synchronous>, transform_indices = @transform_1, window_bounds = array<i64: 32, 1>}, {pipeline_mode = #tpu.pipeline_mode<synchronous>, transform_indices = @transform_2, window_bounds = array<i64: 32, 1>}, {pipeline_mode = #tpu.pipeline_mode<synchronous>, transform_indices = @transform_3, window_bounds = array<i64: 32, 1>}, {pipeline_mode = #tpu.pipeline_mode<synchronous>, transform_indices = @transform_4, window_bounds = array<i64: 1, 1>}, {transform_indices = @transform_5, window_bounds = array<i64: 1, 128>}]} {
    %c0 = arith.constant 0 : index
    %c0_0 = arith.constant 0 : index
    %0 = vector.load %arg1[%c0, %c0_0] : memref<1x128xf32, #tpu.memory_space<vmem>>, vector<1x128xf32>
    %c0_1 = arith.constant 0 : index
    %c0_2 = arith.constant 0 : index
    %1 = vector.load %arg2[%c0_1, %c0_2] : memref<32x1xf32, #tpu.memory_space<vmem>>, vector<32x1xf32>
    %2 = vector.broadcast %1 : vector<32x1xf32> to vector<32x128xf32>
    %3 = vector.broadcast %0 : vector<1x128xf32> to vector<32x128xf32>
    %4 = arith.mulf %2, %3 : vector<32x128xf32>
    %c0_3 = arith.constant 0 : index
    %c0_4 = arith.constant 0 : index
    %5 = vector.load %arg3[%c0_3, %c0_4] : memref<32x1xf32, #tpu.memory_space<vmem>>, vector<32x1xf32>
    %6 = vector.broadcast %5 : vector<32x1xf32> to vector<32x128xf32>
    %7 = arith.addf %4, %6 : vector<32x128xf32>
    %cst = arith.constant 0.000000e+00 : f32
    %8 = vector.broadcast %cst : f32 to vector<32x128xf32>
    %9 = arith.maximumf %7, %8 : vector<32x128xf32>
    %c0_5 = arith.constant 0 : index
    %c0_6 = arith.constant 0 : index
    %10 = vector.load %arg4[%c0_5, %c0_6] : memref<32x1xf32, #tpu.memory_space<vmem>>, vector<32x1xf32>
    %11 = vector.broadcast %10 : vector<32x1xf32> to vector<32x128xf32>
    %12 = arith.mulf %9, %11 : vector<32x128xf32>
    %cst_7 = arith.constant dense<0.000000e+00> : vector<128xf32>
    %13 = vector.multi_reduction <add>, %12, %cst_7 [0] : vector<32x128xf32> to vector<128xf32>
    %14 = vector.shape_cast %13 : vector<128xf32> to vector<1x128xf32>
    %c0_8 = arith.constant 0 : index
    %c0_9 = arith.constant 0 : index
    %15 = vector.load %arg5[%c0_8, %c0_9] : memref<1x1xf32, #tpu.memory_space<vmem>>, vector<1x1xf32>
    %16 = vector.broadcast %15 : vector<1x1xf32> to vector<1x128xf32>
    %17 = arith.addf %14, %16 : vector<1x128xf32>
    %c0_10 = arith.constant 0 : index
    %c0_11 = arith.constant 0 : index
    %18 = vector.load %arg6[%c0_10, %c0_11] : memref<1x128xf32, #tpu.memory_space<vmem>>, vector<1x128xf32>
    tpu.vector_store %arg6[%c0_10, %c0_11], %17 {strides = array<i32>} : memref<1x128xf32, #tpu.memory_space<vmem>>, vector<1x128xf32>,
    return
  }
  func.func @transform_0(%arg0: i32) -> (i32, i32) {
    %c0_i32 = arith.constant 0 : i32
    %c0_i32_0 = arith.constant 0 : i32
    return %c0_i32, %arg0 : i32, i32
  }
  func.func @transform_1(%arg0: i32) -> (i32, i32) {
    %c0_i32 = arith.constant 0 : i32
    %c0_i32_0 = arith.constant 0 : i32
    %c0_i32_1 = arith.constant 0 : i32
    return %c0_i32, %c0_i32_0 : i32, i32
  }
  func.func @transform_2(%arg0: i32) -> (i32, i32) {
    %c0_i32 = arith.constant 0 : i32
    %c0_i32_0 = arith.constant 0 : i32
    %c0_i32_1 = arith.constant 0 : i32
    return %c0_i32, %c0_i32_0 : i32, i32
  }
  func.func @transform_3(%arg0: i32) -> (i32, i32) {
    %c0_i32 = arith.constant 0 : i32
    %c0_i32_0 = arith.constant 0 : i32
    %c0_i32_1 = arith.constant 0 : i32
    return %c0_i32, %c0_i32_0 : i32, i32
  }
  func.func @transform_4(%arg0: i32) -> (i32, i32) {
    %c0_i32 = arith.constant 0 : i32
    %c0_i32_0 = arith.constant 0 : i32
    %c0_i32_1 = arith.constant 0 : i32
    return %c0_i32, %c0_i32_0 : i32, i32
  }
  func.func @transform_5(%arg0: i32) -> (i32, i32) {
    %c0_i32 = arith.constant 0 : i32
    %c0_i32_0 = arith.constant 0 : i32
    return %c0_i32, %arg0 : i32, i32
  }
}

</mosaic_0001>

<bundles_post_ra>
// kernel: tpu_custom_call.1
= control target key start
LH: loop header
LB: loop body
LE: loop exit
PB: predicated region body
PF: predicated region fallthrough
CT: control target
= control target key end

     0   :  { %s257_s0 = inlined_call_operand.vmem [shape: f32[1,128], index: 0, kind: input, shape index: {}]   ;;  %s258_s1 = inlined_call_operand.vmem [shape: f32[32,1], index: 1, kind: input, shape index: {}]   ;;  %s259_s2 = inlined_call_operand.vmem [shape: f32[32,1], index: 2, kind: input, shape index: {}]   ;;  %s260_s3 = inlined_call_operand.vmem [shape: f32[32,1], index: 3, kind: input, shape index: {}]   ;;  %s261_s4 = inlined_call_operand.<no memory space> [shape: f32[1,1], index: 4, kind: input, shape index: {}]   ;;  %s262_s5 = inlined_call_operand.hbm [shape: f32[1,128], index: 5, kind: output, shape index: {}]  }
   0x1   :  { %v10_v0 = vstv %s261_s4 }
   0x2   :  { %11 = vst [vmem:[#allocation2] sm:$0x1] %v10_v0 }
   0x3   :  { %v26_v1 = vld [vmem:[%s258_s1 + $0x10] sm:$0xff]  ;;  %v24_v2 = vld [vmem:[%s258_s1] sm:$0xff]  ;;  %v180_v3 = vmov 0   ;;  %v25_v5 = vld [vmem:[%s258_s1 + $0x8] sm:$0xff] }
   0x4   :  { %157 = vset.pattern.permute.xlu1 %v180_v3  ;;  %156 = vset.pattern.permute.xlu0 %v180_v3  ;;  %v58_v4 = vld [vmem:[%s259_s2] sm:$0xff] }
   0x5   :  { %40 = vperm.xlu1 %157, %v26_v1   ;;  %30 = vperm.xlu0 %156, %v24_v2  }
   0x6   :  { %12 = vsyncpa [#allocation4], 0  ;;  %v27_v6 = vld [vmem:[%s258_s1 + $0x18] sm:$0xff]  ;;  %v59_v7 = vld [vmem:[%s259_s2 + $0x8] sm:$0xff]  ;;  %v133_v47 = vlaneseq }
   0x7   :  { %v61_v8 = vld [vmem:[%s259_s2 + $0x18] sm:$0xff]  ;;  %v60_v9 = vld [vmem:[%s259_s2 + $0x10] sm:$0xff]  ;;  %v91_v10 = vld [vmem:[%s260_s3 + $0x8] sm:$0xff] }
   0x8   :  { %v90_v11 = vld [vmem:[%s260_s3] sm:$0xff]  ;;  %v93_v12 = vld [vmem:[%s260_s3 + $0x18] sm:$0xff]  ;;  %v92_v13 = vld [vmem:[%s260_s3 + $0x10] sm:$0xff]  ;;  %v134_v50 = vshrl.u32 %v133_v47, 7 }
   0x9   :  { %64 = vperm.xlu1 %157, %v58_v4   ;;  %35 = vperm.xlu0 %156, %v25_v5   ;;  %v127_v14 = vld [vmem:[#allocation2] sm:$0x1] }
   0xa   :  { %v153_v19 = vld [vmem:[%s257_s0] ss:$0 sm:$0xff]  ;;  %v135_v52 = vsub.s32 0, %v134_v50  ;;  %s181_s0 = smov [#allocation3]  }
   0xb   :  { %s145_s3 = sshll.u32 %s181_s0, 4  ;;  %s146_s3 = int_to_ptr.vmem [resolvable:$true] %s145_s3 }
   0xc   :  { %s158_s18 = scalar_lea.vmem %s146_s3, 16  ;;  %s162_s19 = scalar_lea.vmem %s146_s3, 32 }
   0xd   :  { %45 = vperm.xlu1 %157, %v27_v6   ;;  %69 = vperm.xlu0 %156, %v59_v7   ;;  %p159_p0 = scmp.ne.s32.totalorder %s146_s3, %s158_s18  ;;  %p163_p1 = scmp.lt.s32.totalorder %s146_s3, %s146_s3 }
   0xe   :  { %p164_p2 = scmp.lt.s32.totalorder %s162_s19, %s158_s18 }
  0x10   :  { %p165_p3 = por %p164_p2, %p163_p1 }
  0x11   :  { %79 = vperm.xlu1 %157, %v61_v8   ;;  %74 = vperm.xlu0 %156, %v60_v9  }
  0x12   :  { %p166_p4 = pnand %p165_p3, %p159_p0 }
  0x15   :  { %101 = vperm.xlu1 %157, %v91_v10   ;;  %96 = vperm.xlu0 %156, %v90_v11  }
  0x19   :  { %111 = vperm.xlu1 %157, %v93_v12   ;;  %106 = vperm.xlu0 %156, %v92_v13  }
  0x1d   :  { %130 = vperm.xlu0 %156, %v127_v14  }
  0x80   :  { %v41_v15 = vpop.permute.xlu1 %40  ;;  %v31_v16 = vpop.permute.xlu0 %30 }
  0x81   :  { %v54_v22 = vmul.f32 %v153_v19, %v31_v16  ;;  %v56_v28 = vmul.f32 %v153_v19, %v41_v15 }
  0x84   :  { %v65_v17 = vpop.permute.xlu1 %64  ;;  %v36_v18 = vpop.permute.xlu0 %35 }
  0x85   :  { %v55_v23 = vmul.f32 %v153_v19, %v36_v18  ;;  %v82_v24 = vadd.f32 %v65_v17, %v54_v22 }
  0x87   :  { %v86_v29 = vmax.f32 %v82_v24, 0.0 }
  0x88   :  { %v46_v20 = vpop.permute.xlu1 %45  ;;  %v70_v21 = vpop.permute.xlu0 %69 }
  0x89   :  { %v83_v25 = vadd.f32 %v70_v21, %v55_v23  ;;  %v57_v30 = vmul.f32 %v153_v19, %v46_v20 }
  0x8b   :  { %v87_v31 = vmax.f32 %v83_v25, 0.0 }
  0x8c   :  { %v80_v26 = vpop.permute.xlu1 %79  ;;  %v75_v27 = vpop.permute.xlu0 %74 }
  0x8d   :  { %v84_v32 = vadd.f32 %v75_v27, %v56_v28  ;;  %v85_v35 = vadd.f32 %v80_v26, %v57_v30 }
  0x8f   :  { %v88_v38 = vmax.f32 %v84_v32, 0.0  ;;  %v89_v41 = vmax.f32 %v85_v35, 0.0 }
  0x90   :  { %v102_v33 = vpop.permute.xlu1 %101  ;;  %v97_v34 = vpop.permute.xlu0 %96 }
  0x91   :  { %v115_v36 = vmul.f32 %v102_v33, %v87_v31  ;;  %v114_v37 = vmul.f32 %v97_v34, %v86_v29 }
  0x93   :  { %v118_v42 = vadd.f32 %v115_v36, %v114_v37 }
  0x94   :  { %v112_v39 = vpop.permute.xlu1 %111  ;;  %v107_v40 = vpop.permute.xlu0 %106 }
  0x95   :  { %v116_v43 = vmul.f32 %v107_v40, %v88_v38  ;;  %v117_v44 = vmul.f32 %v112_v39, %v89_v41 }
  0x97   :  { %v119_v45 = vadd.f32 %v118_v42, %v116_v43 }
  0x98   :  { %v131_v54 = vpop.permute.xlu0 %130 }
  0x99   :  { %v120_v46 = vadd.f32 %v119_v45, %v117_v44  ;;  %v136_v56 = vrot.slane %v131_v54, %v135_v52 }
  0x9b   :  { %v121_v48 = vrot.slane %v120_v46, 4 }
  0x9d   :  { %v122_v49 = vadd.f32 %v121_v48, %v120_v46 }
  0x9f   :  { %v123_v51 = vrot.slane %v122_v49, 2 }
  0xa1   :  { %v124_v53 = vadd.f32 %v123_v51, %v122_v49 }
  0xa3   :  { %v125_v55 = vrot.slane %v124_v53, 1 }
  0xa5   :  { %v126_v57 = vadd.f32 %v125_v55, %v124_v53 }
  0xa7   :  { %v137_v58 = vadd.f32 %v136_v56, %v126_v57 }
  0xa9   :  { %138 = vst [vmem:[#allocation3] sm:$0x1] %v137_v58 }
  0xaa   :  { %169 = shalt.err (!%p166_p4)
}
  0xab   :  { %148 = dma.vmem_to_hbm [thread:$0]  %s146_s3, 16, %s262_s5, [#allocation4]  }
  0xac   :  { %178 = dma.done.wait [#allocation4], 16  }
  0xad   :  { %179 = vsyncadd [#allocation4], 4294967280 }
  0xae   :  { %152 = vsyncpa [#allocation4], 1 }

</bundles_post_ra>
